<compile_context>
chip_gen: v5e
topology: v5e:2x2
jax: 0.10.0
libtpu: 0.0.40
codegen_flags: <defaults>
</compile_context>

<pallas_src>
import numpy as np
import jax
import jax.numpy as jnp
from jax.experimental import pallas as pl
from jax.experimental.pallas import tpu as pltpu

# Mirror the PyTorch module's hyper-parameters / ModuleList order.
KERNEL_SIZES = [2, 3, 4, 5]
DILATIONS = [1, 2, 3, 4]
CONFIGS = [(k, d) for k in KERNEL_SIZES for d in DILATIONS]       # 16 convs
NCFG = len(CONFIGS)
OUT_CH = 16                                                       # Conv1d out_channels
NTOT = NCFG * OUT_CH                                              # 256 output lanes
SHIFTS = sorted({j * d for (k, d) in CONFIGS for j in range(k)})  # 10 distinct shifts
NSHIFT = len(SHIFTS)
MAX_SHIFT = max(SHIFTS)                                           # 16


def make_textcnn_kernel(B, L, C):
    BL = B * L
    KC = NSHIFT * C

    def kernel(xp_ref, w_ref, b_ref, ms_ref, o_ref, xi_ref):
        # In-kernel im2col: gather the 10 statically-shifted time windows of
        # the zero-padded channels-last input into one (B*L, 10*C) VMEM slab.
        # (Static offsets; zero padding keeps every window in-bounds.)
        for si, s in enumerate(SHIFTS):
            xi_ref[:, pl.ds(si * C, C)] = (
                xp_ref[:, pl.ds(s, L), :].reshape(BL, C))
        # One lane-dense GEMM covers every tap of every conv config.
        acc = jnp.dot(xi_ref[...], w_ref[...],
                      preferred_element_type=jnp.float32)         # (B*L, 256)
        # Bias + ReLU, then fused valid-length mask * 1/Lout (broadcast over
        # batch); padded-tail garbage is finite and multiplied by 0.
        y = jnp.maximum(acc + b_ref[...], 0.0)                    # (B*L, 256)
        y = y.reshape(B, L, NTOT) * ms_ref[...]                   # (B, L, 256)
        # Per-batch time average = free reshape + XLU sublane reduction
        # (replaces the old M=2 pooling matmul).
        o_ref[...] = jnp.sum(y, axis=1)                           # (B, 256)

    return kernel


def textcnn_forward(x, w_big, b_stacked, maskscale):
    """x: (B, C, L) float32 (PyTorch NCL layout). Returns (B, NCFG*OUT_CH)."""
    B, C, L = x.shape
    BL, KC = B * L, NSHIFT * C

    # Host-side prep is only channels-last + zero-pad time: no im2col blow-up,
    # no pooling matrix.
    x_pad = jnp.pad(jnp.transpose(x, (0, 2, 1)),
                    ((0, 0), (0, MAX_SHIFT), (0, 0)))             # (B, L+16, C)

    flops = 2 * BL * KC * NTOT
    bytes_accessed = 4 * (x_pad.size + w_big.size + b_stacked.size +
                          maskscale.size + B * NTOT)

    # Single step: the whole (tiny) problem lives in VMEM. No grid, hence no
    # double-buffering (so pl.Buffered(1) hints are unnecessary).
    return pl.pallas_call(
        make_textcnn_kernel(B, L, C),
        out_shape=jax.ShapeDtypeStruct((B, NTOT), jnp.float32),
        in_specs=[pl.BlockSpec(memory_space=pltpu.MemorySpace.VMEM)] * 4,
        out_specs=pl.BlockSpec(memory_space=pltpu.MemorySpace.VMEM),
        scratch_shapes=[pltpu.VMEM((BL, KC), jnp.float32)],       # im2col slab
        cost_estimate=pl.CostEstimate(flops=flops, transcendentals=0,
                                      bytes_accessed=bytes_accessed),
    )(x_pad, w_big, b_stacked, maskscale)


def init_params(key, C):
    """Deterministic Conv1d params; taps scattered into one (K, 256) GEMM weight."""
    w_list, b_list = [], []
    w_big = np.zeros((NSHIFT * C, NTOT), np.float32)
    b_stacked = np.zeros((1, NTOT), np.float32)
    for i, (k, d) in enumerate(CONFIGS):
        key, wk, bk = jax.random.split(key, 3)
        bound = 1.0 / np.sqrt(C * k)
        W = jax.random.uniform(wk, (OUT_CH, C, k), jnp.float32, -bound, bound)
        bv = jax.random.uniform(bk, (OUT_CH,), jnp.float32, -bound, bound)
        w_list.append(W)
        b_list.append(bv)
        Wn = np.asarray(W)
        for j in range(k):
            si = SHIFTS.index(j * d)
            w_big[si * C:(si + 1) * C, i * OUT_CH:(i + 1) * OUT_CH] = Wn[:, :, j].T
        b_stacked[0, i * OUT_CH:(i + 1) * OUT_CH] = np.asarray(bv)
    return w_list, b_list, jnp.asarray(w_big), jnp.asarray(b_stacked)


def make_maskscale(L):
    """(L, 256) table: 1/Lout_i for valid positions of config i, else 0."""
    assert L > MAX_SHIFT, "need L > max dilation*(kernel_size-1) = 16"
    ms = np.zeros((L, NTOT), np.float32)
    for i, (k, d) in enumerate(CONFIGS):
        lout = L - d * (k - 1)
        ms[:lout, i * OUT_CH:(i + 1) * OUT_CH] = 1.0 / lout
    return jnp.asarray(ms)


def ref_forward(x, w_list, b_list):
    """Pure-JAX reference of the PyTorch forward pass."""
    B, C, L = x.shape
    outs = []
    for (k, d), W, bv in zip(CONFIGS, w_list, b_list):
        Lout = L - d * (k - 1)
        y = jnp.zeros((B, OUT_CH, Lout), jnp.float32)
        for j in range(k):
            xj = x[:, :, j * d: j * d + Lout]
            y = y + jnp.einsum('oc,bcl->bol', W[:, :, j], xj)
        y = jnp.maximum(y + bv[None, :, None], 0.0)
        outs.append(jnp.mean(y, axis=2))                          # AdaptiveAvgPool1d(1)
    return jnp.concatenate(outs, axis=1)                          # (B, 256)


if __name__ == "__main__":
    B, C, L = 2, 8, 32        # batch, input_embedding_size, sequence length
    key = jax.random.PRNGKey(0)
    key, xk = jax.random.split(key)
    x = jax.random.normal(xk, (B, C, L), jnp.float32)

    w_list, b_list, w_big, b_stacked = init_params(key, C)
    maskscale = make_maskscale(L)

    fwd = jax.jit(textcnn_forward)
    out = jax.block_until_ready(fwd(x, w_big, b_stacked, maskscale))
    ref = jax.block_until_ready(ref_forward(x, w_list, b_list))

    assert out.shape == (B, NTOT)
    np.testing.assert_allclose(np.asarray(out), np.asarray(ref),
                               rtol=1e-4, atol=1e-4)
    print("KERNEL_OK")
</pallas_src>

<mosaic_0001>
module attributes {stable_mosaic.version = 11 : i64} {
  func.func @kernel(%arg0: memref<2x48x8xf32, #tpu.memory_space<vmem>>, %arg1: memref<80x256xf32, #tpu.memory_space<vmem>>, %arg2: memref<1x256xf32, #tpu.memory_space<vmem>>, %arg3: memref<32x256xf32, #tpu.memory_space<vmem>>, %arg4: memref<2x256xf32, #tpu.memory_space<vmem>>, %arg5: memref<64x80xf32, #tpu.memory_space<vmem>>) attributes {dimension_semantics = [], scalar_prefetch = 0 : i64, scratch_operands = 1 : i64, tpu.core_type = #tpu.core_type<tc>} {
    %c0 = arith.constant 0 : index
    %c0_0 = arith.constant 0 : index
    %c0_1 = arith.constant 0 : index
    %0 = vector.load %arg0[%c0, %c0_0, %c0_1] : memref<2x48x8xf32, #tpu.memory_space<vmem>>, vector<2x32x8xf32>
    %1 = vector.shape_cast %0 : vector<2x32x8xf32> to vector<64x8xf32>
    %c0_2 = arith.constant 0 : index
    %c0_3 = arith.constant 0 : index
    %2 = vector.load %arg5[%c0_2, %c0_3] : memref<64x80xf32, #tpu.memory_space<vmem>>, vector<64x8xf32>
    tpu.vector_store %arg5[%c0_2, %c0_3], %1 {strides = array<i32>} : memref<64x80xf32, #tpu.memory_space<vmem>>, vector<64x8xf32>,
    %c0_4 = arith.constant 0 : index
    %c1 = arith.constant 1 : index
    %c0_5 = arith.constant 0 : index
    %3 = vector.load %arg0[%c0_4, %c1, %c0_5] : memref<2x48x8xf32, #tpu.memory_space<vmem>>, vector<2x32x8xf32>
    %4 = vector.shape_cast %3 : vector<2x32x8xf32> to vector<64x8xf32>
    %c0_6 = arith.constant 0 : index
    %c8 = arith.constant 8 : index
    %5 = vector.load %arg5[%c0_6, %c8] : memref<64x80xf32, #tpu.memory_space<vmem>>, vector<64x8xf32>
    tpu.vector_store %arg5[%c0_6, %c8], %4 {strides = array<i32>} : memref<64x80xf32, #tpu.memory_space<vmem>>, vector<64x8xf32>,
    %c0_7 = arith.constant 0 : index
    %c2 = arith.constant 2 : index
    %c0_8 = arith.constant 0 : index
    %6 = vector.load %arg0[%c0_7, %c2, %c0_8] : memref<2x48x8xf32, #tpu.memory_space<vmem>>, vector<2x32x8xf32>
    %7 = vector.shape_cast %6 : vector<2x32x8xf32> to vector<64x8xf32>
    %c0_9 = arith.constant 0 : index
    %c16 = arith.constant 16 : index
    %8 = vector.load %arg5[%c0_9, %c16] : memref<64x80xf32, #tpu.memory_space<vmem>>, vector<64x8xf32>
    tpu.vector_store %arg5[%c0_9, %c16], %7 {strides = array<i32>} : memref<64x80xf32, #tpu.memory_space<vmem>>, vector<64x8xf32>,
    %c0_10 = arith.constant 0 : index
    %c3 = arith.constant 3 : index
    %c0_11 = arith.constant 0 : index
    %9 = vector.load %arg0[%c0_10, %c3, %c0_11] : memref<2x48x8xf32, #tpu.memory_space<vmem>>, vector<2x32x8xf32>
    %10 = vector.shape_cast %9 : vector<2x32x8xf32> to vector<64x8xf32>
    %c0_12 = arith.constant 0 : index
    %c24 = arith.constant 24 : index
    %11 = vector.load %arg5[%c0_12, %c24] : memref<64x80xf32, #tpu.memory_space<vmem>>, vector<64x8xf32>
    tpu.vector_store %arg5[%c0_12, %c24], %10 {strides = array<i32>} : memref<64x80xf32, #tpu.memory_space<vmem>>, vector<64x8xf32>,
    %c0_13 = arith.constant 0 : index
    %c4 = arith.constant 4 : index
    %c0_14 = arith.constant 0 : index
    %12 = vector.load %arg0[%c0_13, %c4, %c0_14] : memref<2x48x8xf32, #tpu.memory_space<vmem>>, vector<2x32x8xf32>
    %13 = vector.shape_cast %12 : vector<2x32x8xf32> to vector<64x8xf32>
    %c0_15 = arith.constant 0 : index
    %c32 = arith.constant 32 : index
    %14 = vector.load %arg5[%c0_15, %c32] : memref<64x80xf32, #tpu.memory_space<vmem>>, vector<64x8xf32>
    tpu.vector_store %arg5[%c0_15, %c32], %13 {strides = array<i32>} : memref<64x80xf32, #tpu.memory_space<vmem>>, vector<64x8xf32>,
    %c0_16 = arith.constant 0 : index
    %c6 = arith.constant 6 : index
    %c0_17 = arith.constant 0 : index
    %15 = vector.load %arg0[%c0_16, %c6, %c0_17] : memref<2x48x8xf32, #tpu.memory_space<vmem>>, vector<2x32x8xf32>
    %16 = vector.shape_cast %15 : vector<2x32x8xf32> to vector<64x8xf32>
    %c0_18 = arith.constant 0 : index
    %c40 = arith.constant 40 : index
    %17 = vector.load %arg5[%c0_18, %c40] : memref<64x80xf32, #tpu.memory_space<vmem>>, vector<64x8xf32>
    tpu.vector_store %arg5[%c0_18, %c40], %16 {strides = array<i32>} : memref<64x80xf32, #tpu.memory_space<vmem>>, vector<64x8xf32>,
    %c0_19 = arith.constant 0 : index
    %c8_20 = arith.constant 8 : index
    %c0_21 = arith.constant 0 : index
    %18 = vector.load %arg0[%c0_19, %c8_20, %c0_21] : memref<2x48x8xf32, #tpu.memory_space<vmem>>, vector<2x32x8xf32>
    %19 = vector.shape_cast %18 : vector<2x32x8xf32> to vector<64x8xf32>
    %c0_22 = arith.constant 0 : index
    %c48 = arith.constant 48 : index
    %20 = vector.load %arg5[%c0_22, %c48] : memref<64x80xf32, #tpu.memory_space<vmem>>, vector<64x8xf32>
    tpu.vector_store %arg5[%c0_22, %c48], %19 {strides = array<i32>} : memref<64x80xf32, #tpu.memory_space<vmem>>, vector<64x8xf32>,
    %c0_23 = arith.constant 0 : index
    %c9 = arith.constant 9 : index
    %c0_24 = arith.constant 0 : index
    %21 = vector.load %arg0[%c0_23, %c9, %c0_24] : memref<2x48x8xf32, #tpu.memory_space<vmem>>, vector<2x32x8xf32>
    %22 = vector.shape_cast %21 : vector<2x32x8xf32> to vector<64x8xf32>
    %c0_25 = arith.constant 0 : index
    %c56 = arith.constant 56 : index
    %23 = vector.load %arg5[%c0_25, %c56] : memref<64x80xf32, #tpu.memory_space<vmem>>, vector<64x8xf32>
    tpu.vector_store %arg5[%c0_25, %c56], %22 {strides = array<i32>} : memref<64x80xf32, #tpu.memory_space<vmem>>, vector<64x8xf32>,
    %c0_26 = arith.constant 0 : index
    %c12 = arith.constant 12 : index
    %c0_27 = arith.constant 0 : index
    %24 = vector.load %arg0[%c0_26, %c12, %c0_27] : memref<2x48x8xf32, #tpu.memory_space<vmem>>, vector<2x32x8xf32>
    %25 = vector.shape_cast %24 : vector<2x32x8xf32> to vector<64x8xf32>
    %c0_28 = arith.constant 0 : index
    %c64 = arith.constant 64 : index
    %26 = vector.load %arg5[%c0_28, %c64] : memref<64x80xf32, #tpu.memory_space<vmem>>, vector<64x8xf32>
    tpu.vector_store %arg5[%c0_28, %c64], %25 {strides = array<i32>} : memref<64x80xf32, #tpu.memory_space<vmem>>, vector<64x8xf32>,
    %c0_29 = arith.constant 0 : index
    %c16_30 = arith.constant 16 : index
    %c0_31 = arith.constant 0 : index
    %27 = vector.load %arg0[%c0_29, %c16_30, %c0_31] : memref<2x48x8xf32, #tpu.memory_space<vmem>>, vector<2x32x8xf32>
    %28 = vector.shape_cast %27 : vector<2x32x8xf32> to vector<64x8xf32>
    %c0_32 = arith.constant 0 : index
    %c72 = arith.constant 72 : index
    %29 = vector.load %arg5[%c0_32, %c72] : memref<64x80xf32, #tpu.memory_space<vmem>>, vector<64x8xf32>
    tpu.vector_store %arg5[%c0_32, %c72], %28 {strides = array<i32>} : memref<64x80xf32, #tpu.memory_space<vmem>>, vector<64x8xf32>,
    %c0_33 = arith.constant 0 : index
    %c0_34 = arith.constant 0 : index
    %30 = vector.load %arg5[%c0_33, %c0_34] : memref<64x80xf32, #tpu.memory_space<vmem>>, vector<64x80xf32>
    %c0_35 = arith.constant 0 : index
    %c0_36 = arith.constant 0 : index
    %31 = vector.load %arg1[%c0_35, %c0_36] : memref<80x256xf32, #tpu.memory_space<vmem>>, vector<80x256xf32>
    %cst = arith.constant dense<0.000000e+00> : vector<64x256xf32>
    %32 = tpu.matmul %30, %31, %cst {dimension_numbers = #tpu.dot_dimension_numbers<[1], [0], [0], [1], [0, 0, 1, 1], [], []>} : vector<64x80xf32>, vector<80x256xf32>, vector<64x256xf32> -> vector<64x256xf32>
    %c0_37 = arith.constant 0 : index
    %c0_38 = arith.constant 0 : index
    %33 = vector.load %arg2[%c0_37, %c0_38] : memref<1x256xf32, #tpu.memory_space<vmem>>, vector<1x256xf32>
    %34 = vector.broadcast %33 : vector<1x256xf32> to vector<64x256xf32>
    %35 = arith.addf %32, %34 : vector<64x256xf32>
    %cst_39 = arith.constant 0.000000e+00 : f32
    %36 = vector.broadcast %cst_39 : f32 to vector<64x256xf32>
    %37 = arith.maximumf %35, %36 : vector<64x256xf32>
    %38 = vector.shape_cast %37 : vector<64x256xf32> to vector<2x32x256xf32>
    %c0_40 = arith.constant 0 : index
    %c0_41 = arith.constant 0 : index
    %39 = vector.load %arg3[%c0_40, %c0_41] : memref<32x256xf32, #tpu.memory_space<vmem>>, vector<32x256xf32>
    %40 = vector.shape_cast %39 : vector<32x256xf32> to vector<1x32x256xf32>
    %41 = vector.broadcast %40 : vector<1x32x256xf32> to vector<2x32x256xf32>
    %42 = arith.mulf %38, %41 : vector<2x32x256xf32>
    %cst_42 = arith.constant dense<0.000000e+00> : vector<2x256xf32>
    %43 = vector.multi_reduction <add>, %42, %cst_42 [1] : vector<2x32x256xf32> to vector<2x256xf32>
    %c0_43 = arith.constant 0 : index
    %c0_44 = arith.constant 0 : index
    %44 = vector.load %arg4[%c0_43, %c0_44] : memref<2x256xf32, #tpu.memory_space<vmem>>, vector<2x256xf32>
    tpu.vector_store %arg4[%c0_43, %c0_44], %43 {strides = array<i32>} : memref<2x256xf32, #tpu.memory_space<vmem>>, vector<2x256xf32>,
    return
  }
}

</mosaic_0001>

<bundles_post_ra>
// kernel: textcnn_forward.1
= control target key start
LH: loop header
LB: loop body
LE: loop exit
PB: predicated region body
PF: predicated region fallthrough
CT: control target
= control target key end

     0   :  { %s805_s19 = smov 24   ;;  %s806_s20 = smov 8   ;;  %s1305_s0 = inlined_call_operand.vmem [shape: f32[2,48,8], index: 0, kind: input, shape index: {}]   ;;  %s1306_s1 = inlined_call_operand.vmem [shape: f32[80,256], index: 1, kind: input, shape index: {}]   ;;  %s1307_s2 = inlined_call_operand.vmem [shape: f32[1,256], index: 2, kind: input, shape index: {}]   ;;  %s1308_s3 = inlined_call_operand.vmem [shape: f32[32,256], index: 3, kind: input, shape index: {}]   ;;  %s1309_s4 = inlined_call_operand.hbm [shape: f32[2,256], index: 4, kind: output, shape index: {}]  }
   0x1   :  { %v137_v0 = vld [vmem:[%s1305_s0 + $0x33] sm:$0xff]  ;;  %s807_s23 = smov 40  }
   0x2   :  { %v39_v1 = vld [vmem:[%s1305_s0 + $0x31] sm:$0xff]  ;;  %157 = vrot.lane.b32.xlu1 %v137_v0, %s805_s19 }
   0x3   :  { %59 = vrot.lane.b32.xlu0 %v39_v1, %s806_s20  ;;  %v235_v2 = vld [vmem:[%s1305_s0 + $0x36] sm:$0xff] }
   0x4   :  { %255 = vrot.lane.b32.xlu2 %v235_v2, %s807_s23 }
   0x5   :  { %9 = vsyncpa [#allocation4], 0  ;;  %v186_v3 = vld [vmem:[%s1305_s0 + $0x34] sm:$0xff]  ;;  %s808_s28 = smov 32   ;;  %s809_s29 = smov 16   ;;  %v382_v6 = vld [vmem:[%s1305_s0 + $0x3c] sm:$0xff] }
   0x6   :  { %v88_v4 = vld [vmem:[%s1305_s0 + $0x32] sm:$0xff]  ;;  %s810_s6 = smov 48   ;;  %s811_s11 = smov 64   ;;  %v35_v8 = vld [vmem:[%s1305_s0 + $0x1] sm:$0xff]  ;;  %v329_v19 = vld [vmem:[%s1305_s0 + $0x9] sm:$0xff]  ;;  %vm26_vm0 = vcmask 64512  }
   0x7   :  { %v284_v5 = vld [vmem:[%s1305_s0 + $0x38] sm:$0xff]  ;;  %s812_s12 = smov 56   ;;  %v431_v9 = vld [vmem:[%s1305_s0 + $0x40] sm:$0xff]  ;;  %s813_s17 = smov 72   ;;  %v280_v16 = vld [vmem:[%s1305_s0 + $0x8] sm:$0xff]  ;;  %vm75_vm1 = vcmask 130112  }
   0x8   :  { %v333_v7 = vld [vmem:[%s1305_s0 + $0x39] sm:$0xff]  ;;  %v84_v10 = vld [vmem:[%s1305_s0 + $0x2] sm:$0xff]  ;;  %v378_v20 = vld [vmem:[%s1305_s0 + $0xc] sm:$0xff]  ;;  %32 = vst.msk [vmem:[#allocation2 + $0x28] sm:$0xff] %vm26_vm0, %v284_v5  ;;  %vm124_vm2 = vcmask 195712   ;;  %vm173_vm3 = vcmask 261312  }
   0x9   :  { %v133_v11 = vld [vmem:[%s1305_s0 + $0x3] sm:$0xff]  ;;  %v89_v12 = vld [vmem:[%s1305_s0 + $0x3a] sm:$0xff]  ;;  %v427_v22 = vld [vmem:[%s1305_s0 + $0x10] sm:$0xff]  ;;  %33 = vst.msk [vmem:[#allocation2 + $0x30] sm:$0xff] %vm26_vm0, %v431_v9  ;;  %vm222_vm4 = vcmask 326912   ;;  %vm271_vm5 = vcmask 392512  }
   0xa   :  { %206 = vrot.lane.b32.xlu1 %v186_v3, %s808_s28  ;;  %v138_v13 = vld [vmem:[%s1305_s0 + $0x3b] sm:$0xff]  ;;  %v182_v14 = vld [vmem:[%s1305_s0 + $0x4] sm:$0xff]  ;;  %v22_v28 = vld [vmem:[%s1305_s0 + $0x30] sm:$0xff]  ;;  %28 = vst.msk [vmem:[#allocation2 + $0x8] sm:$0xff] %vm26_vm0, %v280_v16  ;;  %vm320_vm6 = vcmask 458112   ;;  %vm369_vm7 = vcmask 523712  }
   0xb   :  { %108 = vrot.lane.b32.xlu0 %v88_v4, %s809_s29  ;;  %v231_v15 = vld [vmem:[%s1305_s0 + $0x6] sm:$0xff]  ;;  %v236_v17 = vld [vmem:[%s1305_s0 + $0x3e] sm:$0xff]  ;;  %31 = vst.msk [vmem:[#allocation2 + $0x20] sm:$0xff] %vm26_vm0, %v22_v28  ;;  %v232_v30 = vld [vmem:[%s1305_s0 + $0xe] sm:$0xff]  ;;  %vm418_vm8 = vcmask 589312   ;;  %vm467_vm9 = vcmask 654912  }
   0xc   :  { %304 = vrot.lane.b32.xlu2 %v284_v5, %s810_s6  ;;  %v334_v18 = vld [vmem:[%s1305_s0 + $0x41] sm:$0xff]  ;;  %v85_v24 = vld [vmem:[%s1305_s0 + $0xa] sm:$0xff]  ;;  %v968_v29 = vld [vmem:[%s1305_s0 + $0x18] sm:$0xff]  ;;  %29 = vst.msk [vmem:[#allocation2 + $0x10] sm:$0xff] %vm26_vm0, %v427_v22  ;;  %vm510_vm10 = vcmask 654336   ;;  %vm699_vm11 = vcmask 1041408  }
   0xd   :  { %v383_v21 = vld [vmem:[%s1305_s0 + $0x44] sm:$0xff]  ;;  %30 = vst.msk [vmem:[#allocation2 + $0x18] sm:$0xff] %vm26_vm0, %v968_v29  ;;  %v502_v34 = vld [vmem:[%s1306_s1 + $0x90] sm:$0xff]  ;;  %v503_v35 = vld [vmem:[%s1306_s1 + $0x98] sm:$0xff]  ;;  %vm707_vm12 = vcmask 1041409   ;;  %vm709_vm13 = vcmask 1043459  }
   0xe   :  { %v432_v23 = vld [vmem:[%s1305_s0 + $0x48] sm:$0xff]  ;;  %v18_v33 = vld [vmem:[%s1305_s0] sm:$0xff]  ;;  %749 = vmatpush.msra.mxu2 %v502_v34  ;;  %759 = vmatpush.msra.mxu3 %v503_v35  ;;  %v498_v38 = vld [vmem:[%s1306_s1 + $0x70] sm:$0xff]  ;;  %vm711_vm14 = vcmask 1045509   ;;  %s724_s22 = sshll.u32 %s1309_s4, 4  ;;  %vm713_vm15 = vcmask 1047559   ;;  %s725_s22 = int_to_ptr.hbm [resolvable:$true] %s724_s22 }
   0xf   :  { %v90_v25 = vld [vmem:[%s1305_s0 + $0x42] sm:$0xff]  ;;  %v134_v26 = vld [vmem:[%s1305_s0 + $0xb] sm:$0xff]  ;;  %34 = vst.msk [vmem:[#allocation2 + $0x38] sm:$0xff] %vm26_vm0, %v432_v23  ;;  %541 = vmatpush.msra.mxu0 %v502_v34  ;;  %582 = vmatpush.msra.mxu1 %v503_v35  ;;  %v499_v39 = vld [vmem:[%s1306_s1 + $0x78] sm:$0xff] }
  0x10   :  { %v139_v27 = vld [vmem:[%s1305_s0 + $0x43] sm:$0xff]  ;;  %27 = vst.msk [vmem:[#allocation2] sm:$0xff] %vm26_vm0, %v18_v33  ;;  %v330_v41 = vld [vmem:[%s1305_s0 + $0x11] sm:$0xff] }
  0x11   :  { %v237_v31 = vld [vmem:[%s1305_s0 + $0x46] sm:$0xff]  ;;  %v1026_v45 = vld [vmem:[%s1305_s0 + $0x14] sm:$0xff]  ;;  %v234_v35 = vld [vmem:[%s1305_s0 + $0x1e] sm:$0xff] }
  0x12   :  { %402 = vrot.lane.b32.xlu1 %v382_v6, %s811_s11  ;;  %v500_v36 = vld [vmem:[%s1306_s1 + $0x80] sm:$0xff]  ;;  %v501_v37 = vld [vmem:[%s1306_s1 + $0x88] sm:$0xff]  ;;  %v494_v46 = vld [vmem:[%s1306_s1 + $0x50] sm:$0xff] }
  0x13   :  { %353 = vrot.lane.b32.xlu0 %v333_v7, %s812_s12  ;;  %750 = vmatpush.msra.mxu2 %v500_v36  ;;  %v496_v40 = vld [vmem:[%s1306_s1 + $0x60] sm:$0xff]  ;;  %v335_v42 = vld [vmem:[%s1305_s0 + $0x49] sm:$0xff]  ;;  %v495_v47 = vld [vmem:[%s1306_s1 + $0x58] sm:$0xff] }
  0x14   :  { %51 = vrot.lane.b32.xlu2 %v35_v8, %s806_s20  ;;  %760 = vmatpush.msra.mxu3 %v501_v37  ;;  %v497_v44 = vld [vmem:[%s1306_s1 + $0x68] sm:$0xff]  ;;  %v492_v48 = vld [vmem:[%s1306_s1 + $0x40] sm:$0xff]  ;;  %v490_v50 = vld [vmem:[%s1306_s1 + $0x30] sm:$0xff] }
  0x15   :  { %542 = vmatpush.msra.mxu0 %v500_v36  ;;  %751 = vmatpush.msra.mxu2 %v498_v38  ;;  %v493_v49 = vld [vmem:[%s1306_s1 + $0x48] sm:$0xff]  ;;  %v491_v51 = vld [vmem:[%s1306_s1 + $0x38] sm:$0xff]  ;;  %v488_v54 = vld [vmem:[%s1306_s1 + $0x20] sm:$0xff] }
  0x16   :  { %583 = vmatpush.msra.mxu1 %v501_v37  ;;  %761 = vmatpush.msra.mxu3 %v499_v39  ;;  %v1053_v52 = vld [vmem:[%s1305_s0 + $0x4c] sm:$0xff]  ;;  %v487_v57 = vld [vmem:[%s1306_s1 + $0x18] sm:$0xff]  ;;  %v484_v60 = vld [vmem:[%s1306_s1] sm:$0xff] }
  0x17   :  { %543 = vmatpush.msra.mxu0 %v498_v38  ;;  %752 = vmatpush.msra.mxu2 %v496_v40  ;;  %v489_v55 = vld [vmem:[%s1306_s1 + $0x28] sm:$0xff]  ;;  %v486_v56 = vld [vmem:[%s1306_s1 + $0x10] sm:$0xff] }
  0x18   :  { %584 = vmatpush.msra.mxu1 %v499_v39  ;;  %762 = vmatpush.msra.mxu3 %v497_v44  ;;  %v485_v61 = vld [vmem:[%s1306_s1 + $0x8] sm:$0xff]  ;;  %v433_v62 = vld [vmem:[%s1305_s0 + $0x50] sm:$0xff] }
  0x19   :  { %753 = vmatpush.msra.mxu2 %v494_v46  ;;  %544 = vmatpush.msra.mxu0 %v496_v40  ;;  %v86_v0 = vld [vmem:[%s1305_s0 + $0x12] sm:$0xff]  ;;  %v91_v3 = vld [vmem:[%s1305_s0 + $0x4a] sm:$0xff]  ;;  %v332_v39 = vld [vmem:[%s1305_s0 + $0x21] sm:$0xff] }
  0x1a   :  { %451 = vrot.lane.b32.xlu1 %v431_v9, %s813_s17  ;;  %585 = vmatpush.msra.mxu1 %v497_v44  ;;  %v135_v4 = vld [vmem:[%s1305_s0 + $0x13] sm:$0xff]  ;;  %v381_v40 = vld [vmem:[%s1305_s0 + $0x24] sm:$0xff] }
  0x1b   :  { %61 = vrot.lane.b32.xlu0 %v333_v7, %s806_s20  ;;  %763 = vmatpush.msra.mxu3 %v495_v47 }
  0x1c   :  { %100 = vrot.lane.b32.xlu2 %v84_v10, %s809_s29  ;;  %754 = vmatpush.msra.mxu2 %v492_v48  ;;  %v233_v10 = vld [vmem:[%s1305_s0 + $0x16] sm:$0xff] }
  0x1d   :  { %545 = vmatpush.msra.mxu0 %v494_v46  ;;  %764 = vmatpush.msra.mxu3 %v493_v49 }
  0x1e   :  { %586 = vmatpush.msra.mxu1 %v495_v47  ;;  %755 = vmatpush.msra.mxu2 %v490_v50 }
  0x1f   :  { %546 = vmatpush.msra.mxu0 %v492_v48  ;;  %765 = vmatpush.msra.mxu3 %v491_v51 }
  0x20   :  { %587 = vmatpush.msra.mxu1 %v493_v49  ;;  %756 = vmatpush.msra.mxu2 %v488_v54 }
  0x21   :  { %766 = vmatpush.msra.mxu3 %v489_v55  ;;  %547 = vmatpush.msra.mxu0 %v490_v50 }
  0x22   :  { %149 = vrot.lane.b32.xlu1 %v133_v11, %s805_s19  ;;  %588 = vmatpush.msra.mxu1 %v491_v51 }
  0x23   :  { %110 = vrot.lane.b32.xlu0 %v89_v12, %s809_s29  ;;  %757 = vmatpush.msra.mxu2 %v486_v56 }
  0x24   :  { %159 = vrot.lane.b32.xlu2 %v138_v13, %s805_s19  ;;  %767 = vmatpush.msra.mxu3 %v487_v57  ;;  %v238_v13 = vld [vmem:[%s1305_s0 + $0x4e] sm:$0xff] }
  0x25   :  { %548 = vmatpush.msra.mxu0 %v488_v54  ;;  %758 = vmatpush.msra.mxu2 %v484_v60 }
  0x26   :  { %589 = vmatpush.msra.mxu1 %v489_v55  ;;  %768 = vmatpush.msra.mxu3 %v485_v61 }
  0x27   :  { %549 = vmatpush.msra.mxu0 %v486_v56 }
  0x28   :  { %590 = vmatpush.msra.mxu1 %v487_v57 }
  0x29   :  { %550 = vmatpush.msra.mxu0 %v484_v60 }
  0x2a   :  { %208 = vrot.lane.b32.xlu1 %v382_v6, %s808_s28  ;;  %591 = vmatpush.msra.mxu1 %v485_v61  ;;  %v140_v6 = vld [vmem:[%s1305_s0 + $0x4b] sm:$0xff] }
  0x2b   :  { %198 = vrot.lane.b32.xlu0 %v182_v14, %s808_s28 }
  0x2c   :  { %247 = vrot.lane.b32.xlu2 %v231_v15, %s807_s23 }
  0x32   :  { %296 = vrot.lane.b32.xlu1 %v280_v16, %s810_s6 }
  0x33   :  { %257 = vrot.lane.b32.xlu0 %v236_v17, %s807_s23 }
  0x34   :  { %306 = vrot.lane.b32.xlu2 %v431_v9, %s810_s6 }
  0x3a   :  { %355 = vrot.lane.b32.xlu1 %v334_v18, %s812_s12 }
  0x3b   :  { %345 = vrot.lane.b32.xlu0 %v329_v19, %s812_s12 }
  0x3c   :  { %394 = vrot.lane.b32.xlu2 %v378_v20, %s811_s11 }
  0x42   :  { %53 = vrot.lane.b32.xlu1 %v329_v19, %s806_s20  ;;  %v336_v19 = vld [vmem:[%s1305_s0 + $0x51] sm:$0xff] }
  0x43   :  { %404 = vrot.lane.b32.xlu0 %v383_v21, %s811_s11 }
  0x44   :  { %63 = vrot.lane.b32.xlu2 %v334_v18, %s806_s20  ;;  %v331_v18 = vld [vmem:[%s1305_s0 + $0x19] sm:$0xff] }
  0x4a   :  { %453 = vrot.lane.b32.xlu1 %v432_v23, %s813_s17 }
  0x4b   :  { %443 = vrot.lane.b32.xlu0 %v427_v22, %s813_s17 }
  0x4c   :  { %102 = vrot.lane.b32.xlu2 %v85_v24, %s809_s29  ;;  %v385_v24 = vld [vmem:[%s1305_s0 + $0x54] sm:$0xff] }
  0x52   :  { %151 = vrot.lane.b32.xlu1 %v134_v26, %s805_s19  ;;  %v429_v26 = vld [vmem:[%s1305_s0 + $0x20] sm:$0xff] }
  0x53   :  { %112 = vrot.lane.b32.xlu0 %v90_v25, %s809_s29 }
  0x54   :  { %161 = vrot.lane.b32.xlu2 %v139_v27, %s805_s19 }
  0x5a   :  { %210 = vrot.lane.b32.xlu1 %v383_v21, %s808_s28  ;;  %v380_v21 = vld [vmem:[%s1305_s0 + $0x1c] sm:$0xff] }
  0x5b   :  { %200 = vrot.lane.b32.xlu0 %v378_v20, %s808_s28 }
  0x5c   :  { %249 = vrot.lane.b32.xlu2 %v232_v30, %s807_s23  ;;  %v87_v30 = vld [vmem:[%s1305_s0 + $0x1a] sm:$0xff] }
  0x5e   :  { %v982_v32 = vpop.permute.xlu2 %255 }
  0x62   :  { %298 = vrot.lane.b32.xlu1 %v427_v22, %s810_s6 }
  0x63   :  { %259 = vrot.lane.b32.xlu0 %v237_v31, %s807_s23 }
  0x64   :  { %308 = vrot.lane.b32.xlu2 %v432_v23, %s810_s6 }
  0x66   :  { %v1018_v43 = vpop.permute.xlu2 %304 }
  0x6a   :  { %357 = vrot.lane.b32.xlu1 %v335_v42, %s812_s12 }
  0x6b   :  { %347 = vrot.lane.b32.xlu0 %v330_v41, %s812_s12 }
  0x6c   :  { %396 = vrot.lane.b32.xlu2 %v1026_v45, %s811_s11 }
  0x6e   :  { %v52_v53 = vpop.permute.xlu2 %51 }
  0x6f   :  { %76 = vst.msk [vmem:[#allocation2] sm:$0xff] %vm75_vm1, %v52_v53 }
  0x72   :  { %55 = vrot.lane.b32.xlu1 %v330_v41, %s806_s20 }
  0x73   :  { %406 = vrot.lane.b32.xlu0 %v1053_v52, %s811_s11 }
  0x74   :  { %v158_v58 = vpop.permute.xlu1 %157  ;;  %65 = vrot.lane.b32.xlu2 %v335_v42, %s806_s20  ;;  %v430_v42 = vld [vmem:[%s1305_s0 + $0x28] sm:$0xff] }
  0x75   :  { %v60_v59 = vpop.permute.xlu0 %59 }
  0x76   :  { %80 = vst.msk [vmem:[#allocation2 + $0x20] sm:$0xff] %vm75_vm1, %v60_v59  ;;  %v101_v63 = vpop.permute.xlu2 %100 }
  0x77   :  { %125 = vst.msk [vmem:[#allocation2] sm:$0xff] %vm124_vm2, %v101_v63 }
  0x7a   :  { %455 = vrot.lane.b32.xlu1 %v433_v62, %s813_s17 }
  0x7b   :  { %445 = vrot.lane.b32.xlu0 %v968_v29, %s813_s17 }
  0x7c   :  { %v207_v1 = vpop.permute.xlu1 %206  ;;  %104 = vrot.lane.b32.xlu2 %v86_v0, %s809_s29 }
  0x7d   :  { %v109_v2 = vpop.permute.xlu0 %108 }
  0x7e   :  { %129 = vst.msk [vmem:[#allocation2 + $0x20] sm:$0xff] %vm124_vm2, %v109_v2  ;;  %v160_v5 = vpop.permute.xlu2 %159 }
  0x7f   :  { %178 = vst.msk [vmem:[#allocation2 + $0x20] sm:$0xff] %vm173_vm3, %v158_v58 }
  0x80   :  { %227 = vst.msk [vmem:[#allocation2 + $0x20] sm:$0xff] %vm222_vm4, %v207_v1 }
  0x81   :  { %276 = vst.msk [vmem:[#allocation2 + $0x20] sm:$0xff] %vm271_vm5, %v982_v32  ;;  %v136_v32 = vld [vmem:[%s1305_s0 + $0x1b] sm:$0xff] }
  0x82   :  { %325 = vst.msk [vmem:[#allocation2 + $0x20] sm:$0xff] %vm320_vm6, %v1018_v43  ;;  %153 = vrot.lane.b32.xlu1 %v135_v4, %s805_s19 }
  0x83   :  { %114 = vrot.lane.b32.xlu0 %v91_v3, %s809_s29 }
  0x84   :  { %v403_v7 = vpop.permute.xlu1 %402  ;;  %163 = vrot.lane.b32.xlu2 %v140_v6, %s805_s19 }
  0x85   :  { %v354_v8 = vpop.permute.xlu0 %353 }
  0x86   :  { %374 = vst.msk [vmem:[#allocation2 + $0x20] sm:$0xff] %vm369_vm7, %v354_v8  ;;  %v248_v9 = vpop.permute.xlu2 %247 }
  0x87   :  { %423 = vst.msk [vmem:[#allocation2 + $0x20] sm:$0xff] %vm418_vm8, %v403_v7 }
  0x8a   :  { %212 = vrot.lane.b32.xlu1 %v1053_v52, %s808_s28 }
  0x8b   :  { %202 = vrot.lane.b32.xlu0 %v1026_v45, %s808_s28 }
  0x8c   :  { %v452_v11 = vpop.permute.xlu1 %451  ;;  %251 = vrot.lane.b32.xlu2 %v233_v10, %s807_s23 }
  0x8d   :  { %v62_v12 = vpop.permute.xlu0 %61  ;;  %472 = vst.msk [vmem:[#allocation2 + $0x20] sm:$0xff] %vm467_vm9, %v452_v11 }
  0x8e   :  { %81 = vst.msk [vmem:[#allocation2 + $0x28] sm:$0xff] %vm75_vm1, %v62_v12  ;;  %v307_v14 = vpop.permute.xlu2 %306 }
  0x92   :  { %300 = vrot.lane.b32.xlu1 %v968_v29, %s810_s6  ;;  %v434_v29 = vld [vmem:[%s1305_s0 + $0x58] sm:$0xff] }
  0x93   :  { %261 = vrot.lane.b32.xlu0 %v238_v13, %s807_s23 }
  0x94   :  { %v150_v15 = vpop.permute.xlu1 %149  ;;  %v480_v17 = vld [vmem:[#allocation2 + $0x20] sm:$0xff]  ;;  %310 = vrot.lane.b32.xlu2 %v433_v62, %s810_s6 }
  0x95   :  { %v111_v16 = vpop.permute.xlu0 %110  ;;  %174 = vst.msk [vmem:[#allocation2] sm:$0xff] %vm173_vm3, %v150_v15  ;;  %737 = vmatmul.msk.f32.vlgmr.msra.gmra.mxu2 %vm510_vm10, %v480_v17  ;;  %745 = vmatmul.msk.f32.vlgmr.msra.gmra.mxu3 %vm510_vm10, %v480_v17 }
  0x96   :  { %130 = vst.msk [vmem:[#allocation2 + $0x28] sm:$0xff] %vm124_vm2, %v111_v16  ;;  %v395_v20 = vpop.permute.xlu2 %394 }
  0x97   :  { %179 = vst.msk [vmem:[#allocation2 + $0x28] sm:$0xff] %vm173_vm3, %v160_v5 }
  0x9a   :  { %359 = vrot.lane.b32.xlu1 %v336_v19, %s812_s12 }
  0x9b   :  { %349 = vrot.lane.b32.xlu0 %v331_v18, %s812_s12 }
  0x9c   :  { %v209_v22 = vpop.permute.xlu1 %208  ;;  %398 = vrot.lane.b32.xlu2 %v380_v21, %s811_s11 }
  0x9d   :  { %v199_v23 = vpop.permute.xlu0 %198  ;;  %228 = vst.msk [vmem:[#allocation2 + $0x28] sm:$0xff] %vm222_vm4, %v209_v22 }
  0x9e   :  { %223 = vst.msk [vmem:[#allocation2] sm:$0xff] %vm222_vm4, %v199_v23  ;;  %v64_v25 = vpop.permute.xlu2 %63 }
  0x9f   :  { %272 = vst.msk [vmem:[#allocation2] sm:$0xff] %vm271_vm5, %v248_v9 }
  0xa0   :  { %82 = vst.msk [vmem:[#allocation2 + $0x30] sm:$0xff] %vm75_vm1, %v64_v25 }
  0xa2   :  { %57 = vrot.lane.b32.xlu1 %v331_v18, %s806_s20 }
  0xa3   :  { %408 = vrot.lane.b32.xlu0 %v385_v24, %s811_s11 }
  0xa4   :  { %v297_v27 = vpop.permute.xlu1 %296  ;;  %447 = vrot.lane.b32.xlu2 %v429_v26, %s813_s17 }
  0xa5   :  { %v258_v28 = vpop.permute.xlu0 %257  ;;  %321 = vst.msk [vmem:[#allocation2] sm:$0xff] %vm320_vm6, %v297_v27 }
  0xa6   :  { %277 = vst.msk [vmem:[#allocation2 + $0x28] sm:$0xff] %vm271_vm5, %v258_v28  ;;  %v103_v31 = vpop.permute.xlu2 %102 }
  0xa7   :  { %326 = vst.msk [vmem:[#allocation2 + $0x28] sm:$0xff] %vm320_vm6, %v307_v14 }
  0xaa   :  { %106 = vrot.lane.b32.xlu1 %v87_v30, %s809_s29 }
  0xab   :  { %457 = vrot.lane.b32.xlu0 %v434_v29, %s813_s17 }
  0xac   :  { %v356_v33 = vpop.permute.xlu1 %355  ;;  %155 = vrot.lane.b32.xlu2 %v136_v32, %s805_s19  ;;  %v504_v32 = vld [vmem:[%s1307_s2] sm:$0x3] }
  0xad   :  { %v346_v34 = vpop.permute.xlu0 %345  ;;  %375 = vst.msk [vmem:[#allocation2 + $0x28] sm:$0xff] %vm369_vm7, %v356_v33 }
  0xae   :  { %370 = vst.msk [vmem:[#allocation2] sm:$0xff] %vm369_vm7, %v346_v34  ;;  %v162_v36 = vpop.permute.xlu2 %161 }
  0xaf   :  { %419 = vst.msk [vmem:[#allocation2] sm:$0xff] %vm418_vm8, %v395_v20 }
  0xb2   :  { %253 = vrot.lane.b32.xlu1 %v234_v35, %s807_s23  ;;  %v1258_v35 = vperm.slane %v504_v32, 0 }
  0xb3   :  { %204 = vrot.lane.b32.xlu0 %v380_v21, %s808_s28 }
  0xb4   :  { %v54_v38 = vpop.permute.xlu1 %53  ;;  %302 = vrot.lane.b32.xlu2 %v429_v26, %s810_s6 }
  0xb5   :  { %v405_v37 = vpop.permute.xlu0 %404  ;;  %77 = vst.msk [vmem:[#allocation2 + $0x8] sm:$0xff] %vm75_vm1, %v54_v38 }
  0xb6   :  { %424 = vst.msk [vmem:[#allocation2 + $0x28] sm:$0xff] %vm418_vm8, %v405_v37  ;;  %v250_v41 = vpop.permute.xlu2 %249 }
  0xb7   :  { %126 = vst.msk [vmem:[#allocation2 + $0x8] sm:$0xff] %vm124_vm2, %v103_v31 }
  0xba   :  { %400 = vrot.lane.b32.xlu1 %v381_v40, %s811_s11 }
  0xbb   :  { %351 = vrot.lane.b32.xlu0 %v332_v39, %s812_s12 }
  0xbc   :  { %v454_v44 = vpop.permute.xlu1 %453  ;;  %449 = vrot.lane.b32.xlu2 %v430_v42, %s813_s17 }
  0xbd   :  { %v444_v43 = vpop.permute.xlu0 %443  ;;  %473 = vst.msk [vmem:[#allocation2 + $0x28] sm:$0xff] %vm467_vm9, %v454_v44 }
  0xbe   :  { %468 = vst.msk [vmem:[#allocation2] sm:$0xff] %vm467_vm9, %v444_v43  ;;  %v309_v45 = vpop.permute.xlu2 %308 }
  0xc4   :  { %v152_v47 = vpop.permute.xlu1 %151  ;;  %v481_v49 = vld [vmem:[#allocation2 + $0x28] sm:$0xff] }
  0xc5   :  { %v113_v46 = vpop.permute.xlu0 %112  ;;  %v476_v48 = vld [vmem:[#allocation2] sm:$0xff]  ;;  %738 = vmatmul.msk.f32.gmra.mxu2 %vm510_vm10, %v481_v49  ;;  %746 = vmatmul.msk.f32.gmra.mxu3 %vm510_vm10, %v481_v49  ;;  %175 = vst.msk [vmem:[#allocation2 + $0x8] sm:$0xff] %vm173_vm3, %v152_v47 }
  0xc6   :  { %131 = vst.msk [vmem:[#allocation2 + $0x30] sm:$0xff] %vm124_vm2, %v113_v46  ;;  %733 = vmatmul.msk.f32.vlgmr.msra.gmra.mxu0 %vm510_vm10, %v476_v48  ;;  %741 = vmatmul.msk.f32.vlgmr.msra.gmra.mxu1 %vm510_vm10, %v476_v48  ;;  %v397_v50 = vpop.permute.xlu2 %396  ;;  %v635_v48 = vld [vmem:[%s1308_s3 + $0x10] sm:$0xff] }
  0xc7   :  { %180 = vst.msk [vmem:[#allocation2 + $0x30] sm:$0xff] %vm173_vm3, %v162_v36  ;;  %v1260_v36 = vperm.slane %v504_v32, 1 }
  0xcc   :  { %v211_v52 = vpop.permute.xlu1 %210 }
  0xcd   :  { %v201_v51 = vpop.permute.xlu0 %200  ;;  %229 = vst.msk [vmem:[#allocation2 + $0x30] sm:$0xff] %vm222_vm4, %v211_v52  ;;  %v636_v52 = vld [vmem:[%s1308_s3 + $0x18] sm:$0xff] }
  0xce   :  { %224 = vst.msk [vmem:[#allocation2 + $0x8] sm:$0xff] %vm222_vm4, %v201_v51  ;;  %v66_v53 = vpop.permute.xlu2 %65 }
  0xcf   :  { %273 = vst.msk [vmem:[#allocation2 + $0x8] sm:$0xff] %vm271_vm5, %v250_v41 }
  0xd0   :  { %83 = vst.msk [vmem:[#allocation2 + $0x38] sm:$0xff] %vm75_vm1, %v66_v53  ;;  %v633_v53 = vld [vmem:[%s1308_s3] sm:$0xff] }
  0xd4   :  { %v299_v55 = vpop.permute.xlu1 %298 }
  0xd5   :  { %v260_v54 = vpop.permute.xlu0 %259  ;;  %322 = vst.msk [vmem:[#allocation2 + $0x8] sm:$0xff] %vm320_vm6, %v299_v55 }
  0xd6   :  { %278 = vst.msk [vmem:[#allocation2 + $0x30] sm:$0xff] %vm271_vm5, %v260_v54  ;;  %v105_v56 = vpop.permute.xlu2 %104  ;;  %v634_v54 = vld [vmem:[%s1308_s3 + $0x8] sm:$0xff] }
  0xd7   :  { %327 = vst.msk [vmem:[#allocation2 + $0x30] sm:$0xff] %vm320_vm6, %v309_v45 }
  0xdc   :  { %v358_v58 = vpop.permute.xlu1 %357 }
  0xdd   :  { %v348_v57 = vpop.permute.xlu0 %347  ;;  %376 = vst.msk [vmem:[#allocation2 + $0x30] sm:$0xff] %vm369_vm7, %v358_v58  ;;  %v637_v58 = vld [vmem:[%s1308_s3 + $0x20] sm:$0xff] }
  0xde   :  { %371 = vst.msk [vmem:[#allocation2 + $0x8] sm:$0xff] %vm369_vm7, %v348_v57  ;;  %v164_v61 = vpop.permute.xlu2 %163 }
  0xdf   :  { %420 = vst.msk [vmem:[#allocation2 + $0x8] sm:$0xff] %vm418_vm8, %v397_v50 }
  0xe4   :  { %v56_v60 = vpop.permute.xlu1 %55 }
  0xe5   :  { %v407_v59 = vpop.permute.xlu0 %406  ;;  %78 = vst.msk [vmem:[#allocation2 + $0x10] sm:$0xff] %vm75_vm1, %v56_v60 }
  0xe6   :  { %425 = vst.msk [vmem:[#allocation2 + $0x30] sm:$0xff] %vm418_vm8, %v407_v59  ;;  %v252_v0 = vpop.permute.xlu2 %251  ;;  %v638_v59 = vld [vmem:[%s1308_s3 + $0x28] sm:$0xff] }
  0xe7   :  { %127 = vst.msk [vmem:[#allocation2 + $0x10] sm:$0xff] %vm124_vm2, %v105_v56 }
  0xec   :  { %v456_v63 = vpop.permute.xlu1 %455 }
  0xed   :  { %v446_v62 = vpop.permute.xlu0 %445  ;;  %474 = vst.msk [vmem:[#allocation2 + $0x30] sm:$0xff] %vm467_vm9, %v456_v63 }
  0xee   :  { %469 = vst.msk [vmem:[#allocation2 + $0x8] sm:$0xff] %vm467_vm9, %v446_v62  ;;  %v311_v5 = vpop.permute.xlu2 %310 }
  0xf4   :  { %v154_v2 = vpop.permute.xlu1 %153  ;;  %v482_v4 = vld [vmem:[#allocation2 + $0x30] sm:$0xff] }
  0xf5   :  { %v115_v1 = vpop.permute.xlu0 %114  ;;  %v477_v3 = vld [vmem:[#allocation2 + $0x8] sm:$0xff]  ;;  %739 = vmatmul.msk.f32.gmra.mxu2 %vm510_vm10, %v482_v4  ;;  %747 = vmatmul.msk.f32.gmra.mxu3 %vm510_vm10, %v482_v4  ;;  %176 = vst.msk [vmem:[#allocation2 + $0x10] sm:$0xff] %vm173_vm3, %v154_v2 }
  0xf6   :  { %132 = vst.msk [vmem:[#allocation2 + $0x38] sm:$0xff] %vm124_vm2, %v115_v1  ;;  %734 = vmatmul.msk.f32.gmra.mxu0 %vm510_vm10, %v477_v3  ;;  %742 = vmatmul.msk.f32.gmra.mxu1 %vm510_vm10, %v477_v3  ;;  %v399_v8 = vpop.permute.xlu2 %398 }
  0xf7   :  { %181 = vst.msk [vmem:[#allocation2 + $0x38] sm:$0xff] %vm173_vm3, %v164_v61 }
  0xfc   :  { %v213_v7 = vpop.permute.xlu1 %212 }
  0xfd   :  { %v203_v6 = vpop.permute.xlu0 %202  ;;  %230 = vst.msk [vmem:[#allocation2 + $0x38] sm:$0xff] %vm222_vm4, %v213_v7 }
  0xfe   :  { %225 = vst.msk [vmem:[#allocation2 + $0x10] sm:$0xff] %vm222_vm4, %v203_v6  ;;  %v448_v13 = vpop.permute.xlu2 %447 }
  0xff   :  { %274 = vst.msk [vmem:[#allocation2 + $0x10] sm:$0xff] %vm271_vm5, %v252_v0 }
 0x104   :  { %v301_v10 = vpop.permute.xlu1 %300 }
 0x105   :  { %v262_v9 = vpop.permute.xlu0 %261  ;;  %323 = vst.msk [vmem:[#allocation2 + $0x10] sm:$0xff] %vm320_vm6, %v301_v10  ;;  %v640_v10 = vld [vmem:[%s1308_s3 + $0x38] sm:$0xff] }
 0x106   :  { %279 = vst.msk [vmem:[#allocation2 + $0x38] sm:$0xff] %vm271_vm5, %v262_v9  ;;  %v156_v17 = vpop.permute.xlu2 %155  ;;  %v639_v9 = vld [vmem:[%s1308_s3 + $0x30] sm:$0xff]  ;;  %s814_s3 = smov [#allocation3]  }
 0x107   :  { %328 = vst.msk [vmem:[#allocation2 + $0x38] sm:$0xff] %vm320_vm6, %v311_v5  ;;  %s722_s20 = sshll.u32 %s814_s3, 4  ;;  %s723_s20 = int_to_ptr.vmem [resolvable:$true] %s722_s20 }
 0x10c   :  { %v360_v12 = vpop.permute.xlu1 %359 }
 0x10d   :  { %v350_v11 = vpop.permute.xlu0 %349  ;;  %377 = vst.msk [vmem:[#allocation2 + $0x38] sm:$0xff] %vm369_vm7, %v360_v12 }
 0x10e   :  { %372 = vst.msk [vmem:[#allocation2 + $0x10] sm:$0xff] %vm369_vm7, %v350_v11  ;;  %v303_v20 = vpop.permute.xlu2 %302 }
 0x10f   :  { %421 = vst.msk [vmem:[#allocation2 + $0x10] sm:$0xff] %vm418_vm8, %v399_v8 }
 0x110   :  { %470 = vst.msk [vmem:[#allocation2 + $0x10] sm:$0xff] %vm467_vm9, %v448_v13 }
 0x114   :  { %v58_v15 = vpop.permute.xlu1 %57 }
 0x115   :  { %v409_v14 = vpop.permute.xlu0 %408  ;;  %79 = vst.msk [vmem:[#allocation2 + $0x18] sm:$0xff] %vm75_vm1, %v58_v15 }
 0x116   :  { %426 = vst.msk [vmem:[#allocation2 + $0x38] sm:$0xff] %vm418_vm8, %v409_v14  ;;  %v450_v24 = vpop.permute.xlu2 %449 }
 0x117   :  { %v478_v16 = vld [vmem:[#allocation2 + $0x10] sm:$0xff] }
 0x118   :  { %735 = vmatmul.msk.f32.gmra.mxu0 %vm510_vm10, %v478_v16  ;;  %743 = vmatmul.msk.f32.gmra.mxu1 %vm510_vm10, %v478_v16  ;;  %v564_v28 = vpop.f32.mrf.mxu2  ;;  %v605_v29 = vpop.f32.mrf.mxu3 }
 0x119   :  { %v565_v41 = vadd.f32 %v564_v28, %v1258_v35  ;;  %v606_v42 = vadd.f32 %v605_v29, %v1260_v36 }
 0x11b   :  { %v625_v50 = vmax.f32 %v565_v41, 0.0  ;;  %v626_v51 = vmax.f32 %v606_v42, 0.0 }
 0x11c   :  { %v107_v19 = vpop.permute.xlu1 %106 }
 0x11d   :  { %v458_v18 = vpop.permute.xlu0 %457  ;;  %128 = vst.msk [vmem:[#allocation2 + $0x18] sm:$0xff] %vm124_vm2, %v107_v19  ;;  %v649_v61 = vmul.f32 %v633_v53, %v625_v50  ;;  %v650_v62 = vmul.f32 %v634_v54, %v626_v51 }
 0x11e   :  { %475 = vst.msk [vmem:[#allocation2 + $0x38] sm:$0xff] %vm467_vm9, %v458_v18 }
 0x11f   :  { %177 = vst.msk [vmem:[#allocation2 + $0x18] sm:$0xff] %vm173_vm3, %v156_v17 }
 0x124   :  { %v254_v22 = vpop.permute.xlu1 %253 }
 0x125   :  { %v205_v21 = vpop.permute.xlu0 %204  ;;  %v483_v23 = vld [vmem:[#allocation2 + $0x38] sm:$0xff] }
 0x126   :  { %226 = vst.msk [vmem:[#allocation2 + $0x18] sm:$0xff] %vm222_vm4, %v205_v21  ;;  %740 = vmatmul.msk.f32.gmra.mxu2 %vm510_vm10, %v483_v23  ;;  %748 = vmatmul.msk.f32.gmra.mxu3 %vm510_vm10, %v483_v23 }
 0x127   :  { %275 = vst.msk [vmem:[#allocation2 + $0x18] sm:$0xff] %vm271_vm5, %v254_v22 }
 0x128   :  { %324 = vst.msk [vmem:[#allocation2 + $0x18] sm:$0xff] %vm320_vm6, %v303_v20 }
 0x12c   :  { %v401_v26 = vpop.permute.xlu1 %400 }
 0x12d   :  { %v352_v25 = vpop.permute.xlu0 %351 }
 0x12e   :  { %373 = vst.msk [vmem:[#allocation2 + $0x18] sm:$0xff] %vm369_vm7, %v352_v25 }
 0x12f   :  { %422 = vst.msk [vmem:[#allocation2 + $0x18] sm:$0xff] %vm418_vm8, %v401_v26 }
 0x130   :  { %471 = vst.msk [vmem:[#allocation2 + $0x18] sm:$0xff] %vm467_vm9, %v450_v24 }
 0x137   :  { %v479_v27 = vld [vmem:[#allocation2 + $0x18] sm:$0xff] }
 0x138   :  { %736 = vmatmul.msk.f32.gmra.mxu0 %vm510_vm10, %v479_v27  ;;  %744 = vmatmul.msk.f32.gmra.mxu1 %vm510_vm10, %v479_v27 }
 0x143   :  { %v552_v33 = vpop.f32.mrf.mxu0  ;;  %v593_v34 = vpop.f32.mrf.mxu1 }
 0x144   :  { %v553_v15 = vadd.f32 %v552_v33, %v1258_v35  ;;  %v594_v16 = vadd.f32 %v593_v34, %v1260_v36 }
 0x146   :  { %v617_v27 = vmax.f32 %v553_v15, 0.0  ;;  %v618_v28 = vmax.f32 %v594_v16, 0.0 }
 0x148   :  { %v567_v30 = vpop.f32.mrf.mxu2  ;;  %v608_v31 = vpop.f32.mrf.mxu3 }
 0x149   :  { %v568_v37 = vadd.f32 %v567_v30, %v1258_v35  ;;  %v609_v40 = vadd.f32 %v608_v31, %v1260_v36 }
 0x14b   :  { %v627_v47 = vmax.f32 %v568_v37, 0.0  ;;  %v628_v49 = vmax.f32 %v609_v40, 0.0 }
 0x14d   :  { %v651_v57 = vmul.f32 %v635_v48, %v627_v47  ;;  %v652_v60 = vmul.f32 %v636_v52, %v628_v49 }
 0x14f   :  { %v675_v7 = vadd.f32 %v651_v57, %v649_v61  ;;  %v684_v11 = vadd.f32 %v652_v60, %v650_v62 }
 0x173   :  { %v555_v43 = vpop.f32.mrf.mxu0  ;;  %v596_v44 = vpop.f32.mrf.mxu1 }
 0x174   :  { %v556_v8 = vadd.f32 %v555_v43, %v1258_v35  ;;  %v597_v12 = vadd.f32 %v596_v44, %v1260_v36 }
 0x176   :  { %v619_v23 = vmax.f32 %v556_v8, 0.0  ;;  %v620_v24 = vmax.f32 %v597_v12, 0.0 }
 0x178   :  { %v570_v38 = vpop.f32.mrf.mxu2  ;;  %v611_v39 = vpop.f32.mrf.mxu3  ;;  %v643_v33 = vmul.f32 %v635_v48, %v619_v23  ;;  %v644_v34 = vmul.f32 %v636_v52, %v620_v24 }
 0x179   :  { %v571_v45 = vadd.f32 %v570_v38, %v1258_v35  ;;  %v612_v46 = vadd.f32 %v611_v39, %v1260_v36  ;;  %v641_v38 = vmul.f32 %v633_v53, %v617_v27  ;;  %v642_v39 = vmul.f32 %v634_v54, %v618_v28 }
 0x17b   :  { %v629_v55 = vmax.f32 %v571_v45, 0.0  ;;  %v630_v56 = vmax.f32 %v612_v46, 0.0  ;;  %v657_v49 = vadd.f32 %v643_v33, %v641_v38  ;;  %v666_v50 = vadd.f32 %v644_v34, %v642_v39 }
 0x17d   :  { %v653_v1 = vmul.f32 %v637_v58, %v629_v55  ;;  %v654_v2 = vmul.f32 %v638_v59, %v630_v56 }
 0x17f   :  { %v676_v19 = vadd.f32 %v675_v7, %v653_v1  ;;  %v685_v20 = vadd.f32 %v684_v11, %v654_v2 }
 0x195   :  { %v558_v3 = vpop.f32.mrf.mxu0  ;;  %v599_v4 = vpop.f32.mrf.mxu1 }
 0x196   :  { %v559_v17 = vadd.f32 %v558_v3, %v1258_v35  ;;  %v600_v18 = vadd.f32 %v599_v4, %v1260_v36 }
 0x198   :  { %v621_v29 = vmax.f32 %v559_v17, 0.0  ;;  %v622_v30 = vmax.f32 %v600_v18, 0.0 }
 0x19a   :  { %v645_v40 = vmul.f32 %v637_v58, %v621_v29  ;;  %v646_v41 = vmul.f32 %v638_v59, %v622_v30 }
 0x19c   :  { %v658_v48 = vadd.f32 %v657_v49, %v645_v40  ;;  %v667_v52 = vadd.f32 %v666_v50, %v646_v41 }
 0x1a9   :  { %v573_v63 = vpop.f32.mrf.mxu2  ;;  %v614_v0 = vpop.f32.mrf.mxu3 }
 0x1aa   :  { %v574_v5 = vadd.f32 %v573_v63, %v1258_v35  ;;  %v615_v6 = vadd.f32 %v614_v0, %v1260_v36 }
 0x1ac   :  { %v631_v13 = vmax.f32 %v574_v5, 0.0  ;;  %v632_v14 = vmax.f32 %v615_v6, 0.0 }
 0x1ae   :  { %v655_v21 = vmul.f32 %v639_v9, %v631_v13  ;;  %v656_v22 = vmul.f32 %v640_v10, %v632_v14 }
 0x1b0   :  { %v677_v25 = vadd.f32 %v676_v19, %v655_v21  ;;  %v686_v26 = vadd.f32 %v685_v20, %v656_v22 }
 0x1b2   :  { %v678_v31 = vrot.slane %v677_v25, 4  ;;  %v687_v32 = vrot.slane %v686_v26, 4 }
 0x1b4   :  { %v688_v37 = vadd.f32 %v687_v32, %v686_v26  ;;  %v679_v44 = vadd.f32 %v678_v31, %v677_v25 }
 0x1b5   :  { %v561_v42 = vpop.f32.mrf.mxu0  ;;  %v602_v43 = vpop.f32.mrf.mxu1 }
 0x1b6   :  { %v689_v45 = vrot.slane %v688_v37, 2  ;;  %v562_v46 = vadd.f32 %v561_v42, %v1258_v35  ;;  %v603_v47 = vadd.f32 %v602_v43, %v1260_v36  ;;  %v680_v57 = vrot.slane %v679_v44, 2 }
 0x1b8   :  { %v690_v51 = vadd.f32 %v689_v45, %v688_v37  ;;  %v623_v55 = vmax.f32 %v562_v46, 0.0  ;;  %v624_v56 = vmax.f32 %v603_v47, 0.0  ;;  %v681_v61 = vadd.f32 %v680_v57, %v679_v44 }
 0x1ba   :  { %v647_v53 = vmul.f32 %v639_v9, %v623_v55  ;;  %v648_v54 = vmul.f32 %v640_v10, %v624_v56  ;;  %v691_v58 = vrot.slane %v690_v51, 1  ;;  %v682_v36 = vrot.slane %v681_v61, 1 }
 0x1bc   :  { %v659_v59 = vadd.f32 %v658_v48, %v647_v53  ;;  %v668_v60 = vadd.f32 %v667_v52, %v648_v54  ;;  %v692_v0 = vadd.f32 %v691_v58, %v690_v51  ;;  %v683_v7 = vadd.f32 %v682_v36, %v681_v61 }
 0x1be   :  { %v660_v62 = vrot.slane %v659_v59, 4  ;;  %v669_v63 = vrot.slane %v668_v60, 4  ;;  %v698_v4 = vrot.slane %v692_v0, 6 }
 0x1c0   :  { %v661_v35 = vadd.f32 %v660_v62, %v659_v59  ;;  %v670_v1 = vadd.f32 %v669_v63, %v668_v60  ;;  %v701_v11 = vsel %vm699_vm11, %v683_v7, %v698_v4 }
 0x1c1   :  { %v706_v14 = vrot.slane %v701_v11, 7 }
 0x1c2   :  { %v662_v2 = vrot.slane %v661_v35, 2  ;;  %v671_v3 = vrot.slane %v670_v1, 2 }
 0x1c4   :  { %v663_v5 = vadd.f32 %v662_v2, %v661_v35  ;;  %v672_v6 = vadd.f32 %v671_v3, %v670_v1 }
 0x1c6   :  { %v664_v8 = vrot.slane %v663_v5, 1  ;;  %v673_v9 = vrot.slane %v672_v6, 1 }
 0x1c8   :  { %v674_v10 = vadd.f32 %v673_v9, %v672_v6  ;;  %v665_v12 = vadd.f32 %v664_v8, %v663_v5 }
 0x1ca   :  { %v697_v13 = vrot.slane %v674_v10, 6 }
 0x1cc   :  { %v700_v15 = vsel %vm699_vm11, %v665_v12, %v697_v13 }
 0x1cd   :  { %v708_v16 = vsel %vm707_vm12, %v706_v14, %v700_v15 }
 0x1ce   :  { %v710_v17 = vsel %vm709_vm13, %v706_v14, %v708_v16 }
 0x1cf   :  { %v712_v18 = vsel %vm711_vm14, %v706_v14, %v710_v17 }
 0x1d0   :  { %v714_v19 = vsel %vm713_vm15, %v706_v14, %v712_v18 }
 0x1d1   :  { %716 = vst [vmem:[#allocation3] sm:$0xf] %v714_v19 }
 0x1d2   :  { %727 = dma.vmem_to_hbm [thread:$0]  %s723_s20, 64, %s725_s22, [#allocation4]  }
 0x1d3   :  { %803 = dma.done.wait [#allocation4], 64  }
 0x1d4   :  { %804 = vsyncadd [#allocation4], 4294967232 }
 0x1d5   :  { %732 = vsyncpa [#allocation4], 1 }

</bundles_post_ra>
